<compile_context>
chip_gen: v6e
topology: v6e:2x2x1
jax: 0.10.0
libtpu: 0.0.40
codegen_flags: <defaults>
</compile_context>

<pallas_src>
from functools import partial

import jax
import jax.numpy as jnp
from jax import lax
from jax.experimental import pallas as pl
from jax.experimental.pallas import tpu as pltpu

CIN, COUT, KH, KW = 1, 2, 3, 3   # weight shape the (synthetic) conv_transpose2d implies


def _round_up(x, m):
    return ((x + m - 1) // m) * m


def _largest_divisor_leq(n, cap):
    for t in range(min(n, cap), 0, -1):
        if n % t == 0:
            return t
    return 1


def _convT_sigmoid_kernel(x_ref, w_ref, o_ref, xpad_ref, *, b_tile, h, w, ho_pad, wo_pad):
    # x_ref:    (b_tile, CIN, h, w)            f32 VMEM  -- batch block (un-padded)
    # w_ref:    (CIN*COUT*KH*KW,)              f32 SMEM  -- weight, row-major (no flip needed)
    # o_ref:    (b_tile, COUT*ho_pad, wo_pad)  f32 VMEM  -- lane-dense output slab
    # xpad_ref: (b_tile, CIN, ho_pad, wo_pad)  f32 VMEM scratch (only [0:h,0:w] is valid data)

    # Stage the block into the lane-dense scratch at the origin: aligned start, single
    # partial store, no (8,128) boundary-crossing offsets.
    xpad_ref[:, :, 0:h, 0:w] = x_ref[...]

    # Valid-region mask, built once per invocation and reused for every sample.
    # Masking the loaded value to zero outside [0:h, 0:w] makes the kernel independent
    # of whatever garbage sits in the scratch border — no zero fill is ever needed.
    row = lax.broadcasted_iota(jnp.int32, (ho_pad, wo_pad), 0)
    col = lax.broadcasted_iota(jnp.int32, (ho_pad, wo_pad), 1)
    valid = (row < h) & (col < w)

    # Hoist the CIN*COUT*KH*KW (= 18) SMEM scalar weight reads out of the MAC chain.
    wv = [[[[w_ref[((ci * COUT + co) * KH + ki) * KW + kj]
             for kj in range(KW)]
            for ki in range(KH)]
           for co in range(COUT)]
          for ci in range(CIN)]

    for b in range(b_tile):
        acc = [jnp.zeros((ho_pad, wo_pad), jnp.float32) for _ in range(COUT)]
        for ci in range(CIN):
            x0 = jnp.where(valid, xpad_ref[b, ci], 0.0)   # x at origin, zeros elsewhere
            for ki in range(KH):
                # conv_transpose: out[i,j] += x[i-ki, j-kj] * W[ki,kj]
                # roll shifts data toward higher indices; wrapped rows/lanes (>= h / >= w
                # after masking) are zeros, so the wraparound never corrupts valid output.
                xr = pltpu.roll(x0, ki, axis=0) if ki else x0
                for kj in range(KW):
                    patch = pltpu.roll(xr, kj, axis=1) if kj else xr
                    for co in range(COUT):
                        acc[co] = acc[co] + patch * wv[ci][co][ki][kj]
        # One fused sigmoid (EUP) + one unmasked lane-dense store of the whole sample.
        o_ref[b] = jax.nn.sigmoid(jnp.concatenate(acc, axis=0))


@jax.jit
def conv_transpose2d_sigmoid(x, weight):
    """x: (N, CIN, H, W); weight: (CIN, COUT, KH, KW) (PyTorch conv_transpose2d layout).
    Returns sigmoid(conv_transpose2d(x, weight)) with stride=1, padding=0."""
    n, cin, h, w = x.shape
    assert cin == CIN and weight.shape == (CIN, COUT, KH, KW)

    ho, wo = h + KH - 1, w + KW - 1          # 18, 18
    ho_pad = _round_up(ho, 8)                # 24  (sublane-aligned per-channel slab)
    wo_pad = _round_up(wo, 128)              # 128 (lane-dense)
    b_tile = _largest_divisor_leq(n, 8)      # batch blocking; amortizes per-grid-step overhead

    # Row-major flatten; the roll-based formulation uses W[ci,co,ki,kj] directly (no flip).
    w_flat = weight.astype(jnp.float32).reshape(-1)

    kernel = partial(_convT_sigmoid_kernel, b_tile=b_tile, h=h, w=w,
                     ho_pad=ho_pad, wo_pad=wo_pad)

    cost = pl.CostEstimate(
        flops=2 * n * CIN * COUT * KH * KW * ho * wo,
        transcendentals=n * COUT * ho * wo,
        bytes_accessed=n * (CIN * h * w + COUT * ho_pad * wo_pad) * 4,
    )

    out_slab = pl.pallas_call(
        kernel,
        grid=(n // b_tile,),
        out_shape=jax.ShapeDtypeStruct((n, COUT * ho_pad, wo_pad), jnp.float32),
        in_specs=[
            pl.BlockSpec((b_tile, CIN, h, w), lambda b: (b, 0, 0, 0)),
            pl.BlockSpec(memory_space=pltpu.MemorySpace.SMEM),   # tiny weight in SMEM
        ],
        out_specs=pl.BlockSpec((b_tile, COUT * ho_pad, wo_pad), lambda b: (b, 0, 0)),
        scratch_shapes=[pltpu.VMEM((b_tile, CIN, ho_pad, wo_pad), jnp.float32)],
        compiler_params=pltpu.CompilerParams(dimension_semantics=("parallel",)),
        cost_estimate=cost,
    )(x.astype(jnp.float32), w_flat)

    # NOTE: this crop is not free (XLA re-reads the padded slab from HBM); at N=1 it is
    # ~25 KiB and negligible.
    # TODO(synk): for large N, move batch onto the lane axis ((CIN,H,W,N)->(COUT,Ho,Wo,N))
    # so every lane is useful and no crop/padded writeback is needed.
    return out_slab.reshape(n, COUT, ho_pad, wo_pad)[:, :, :ho, :wo]


def _reference(x, weight):
    """Pure-JAX reference: scatter form of conv_transpose2d + sigmoid."""
    n, cin, h, w = x.shape
    ho, wo = h + KH - 1, w + KW - 1
    out = jnp.zeros((n, COUT, ho, wo), jnp.float32)
    xf = x.astype(jnp.float32)
    wf = weight.astype(jnp.float32)
    for ci in range(cin):
        for co in range(COUT):
            for ki in range(KH):
                for kj in range(KW):
                    out = out.at[:, co, ki:ki + h, kj:kj + w].add(xf[:, ci] * wf[ci, co, ki, kj])
    return jax.nn.sigmoid(out)


if __name__ == "__main__":
    key = jax.random.PRNGKey(0)
    kx, kw = jax.random.split(key)

    # input consistent with the module: x1 = torch.randn(1, 1, 16, 16)
    x1 = jax.random.normal(kx, (1, CIN, 16, 16), dtype=jnp.float32)
    # deterministic synthetic weight, shape (Cin, Cout, kH, kW) = (1, 2, 3, 3)
    weight = jax.random.normal(kw, (CIN, COUT, KH, KW), dtype=jnp.float32) * (1.0 / 3.0)

    out = jax.block_until_ready(conv_transpose2d_sigmoid(x1, weight))
    assert out.shape == (1, COUT, 18, 18), out.shape

    ref = _reference(x1, weight)
    assert jnp.allclose(out, ref, atol=1e-5, rtol=1e-5), "mismatch vs reference"

    print("KERNEL_OK")
</pallas_src>

<mosaic_0001>
module attributes {stable_mosaic.version = 11 : i64} {
  func.func @_convT_sigmoid_kernel(%arg0: i32, %arg1: memref<1x1x16x16xf32, #tpu.memory_space<vmem>>, %arg2: memref<18xf32, #tpu.memory_space<smem>>, %arg3: memref<1x48x128xf32, #tpu.memory_space<vmem>>, %arg4: memref<1x1x24x128xf32, #tpu.memory_space<vmem>>) attributes {dimension_semantics = [#tpu.dimension_semantics<parallel>], iteration_bounds = array<i64: 1>, scalar_prefetch = 0 : i64, scratch_operands = 1 : i64, tpu.core_type = #tpu.core_type<tc>, window_params = [{transform_indices = @transform_0, window_bounds = array<i64: 1, 1, 16, 16>}, {transform_indices = @transform_1, window_bounds = array<i64: 18>}, {transform_indices = @transform_2, window_bounds = array<i64: 1, 48, 128>}]} {
    %c0 = arith.constant 0 : index
    %c0_0 = arith.constant 0 : index
    %c0_1 = arith.constant 0 : index
    %c0_2 = arith.constant 0 : index
    %0 = vector.load %arg1[%c0, %c0_0, %c0_1, %c0_2] : memref<1x1x16x16xf32, #tpu.memory_space<vmem>>, vector<1x1x16x16xf32>
    %c0_3 = arith.constant 0 : index
    %c0_4 = arith.constant 0 : index
    %c0_5 = arith.constant 0 : index
    %c0_6 = arith.constant 0 : index
    %1 = vector.load %arg4[%c0_3, %c0_4, %c0_5, %c0_6] : memref<1x1x24x128xf32, #tpu.memory_space<vmem>>, vector<1x1x16x16xf32>
    tpu.vector_store %arg4[%c0_3, %c0_4, %c0_5, %c0_6], %0 {strides = array<i32>} : memref<1x1x24x128xf32, #tpu.memory_space<vmem>>, vector<1x1x16x16xf32>,
    %2 = tpu.iota {dimensions = array<i32: 0>} : vector<24x128xi32>
    %3 = tpu.iota {dimensions = array<i32: 1>} : vector<24x128xi32>
    %c16_i32 = arith.constant 16 : i32
    %4 = vector.broadcast %c16_i32 : i32 to vector<24x128xi32>
    %5 = arith.cmpi slt, %2, %4 : vector<24x128xi32>
    %c16_i32_7 = arith.constant 16 : i32
    %6 = vector.broadcast %c16_i32_7 : i32 to vector<24x128xi32>
    %7 = arith.cmpi slt, %3, %6 : vector<24x128xi32>
    %8 = arith.andi %5, %7 : vector<24x128xi1>
    %c0_8 = arith.constant 0 : index
    %9 = memref.load %arg2[%c0_8] : memref<18xf32, #tpu.memory_space<smem>>
    %c1 = arith.constant 1 : index
    %10 = memref.load %arg2[%c1] : memref<18xf32, #tpu.memory_space<smem>>
    %c2 = arith.constant 2 : index
    %11 = memref.load %arg2[%c2] : memref<18xf32, #tpu.memory_space<smem>>
    %c3 = arith.constant 3 : index
    %12 = memref.load %arg2[%c3] : memref<18xf32, #tpu.memory_space<smem>>
    %c4 = arith.constant 4 : index
    %13 = memref.load %arg2[%c4] : memref<18xf32, #tpu.memory_space<smem>>
    %c5 = arith.constant 5 : index
    %14 = memref.load %arg2[%c5] : memref<18xf32, #tpu.memory_space<smem>>
    %c6 = arith.constant 6 : index
    %15 = memref.load %arg2[%c6] : memref<18xf32, #tpu.memory_space<smem>>
    %c7 = arith.constant 7 : index
    %16 = memref.load %arg2[%c7] : memref<18xf32, #tpu.memory_space<smem>>
    %c8 = arith.constant 8 : index
    %17 = memref.load %arg2[%c8] : memref<18xf32, #tpu.memory_space<smem>>
    %c9 = arith.constant 9 : index
    %18 = memref.load %arg2[%c9] : memref<18xf32, #tpu.memory_space<smem>>
    %c10 = arith.constant 10 : index
    %19 = memref.load %arg2[%c10] : memref<18xf32, #tpu.memory_space<smem>>
    %c11 = arith.constant 11 : index
    %20 = memref.load %arg2[%c11] : memref<18xf32, #tpu.memory_space<smem>>
    %c12 = arith.constant 12 : index
    %21 = memref.load %arg2[%c12] : memref<18xf32, #tpu.memory_space<smem>>
    %c13 = arith.constant 13 : index
    %22 = memref.load %arg2[%c13] : memref<18xf32, #tpu.memory_space<smem>>
    %c14 = arith.constant 14 : index
    %23 = memref.load %arg2[%c14] : memref<18xf32, #tpu.memory_space<smem>>
    %c15 = arith.constant 15 : index
    %24 = memref.load %arg2[%c15] : memref<18xf32, #tpu.memory_space<smem>>
    %c16 = arith.constant 16 : index
    %25 = memref.load %arg2[%c16] : memref<18xf32, #tpu.memory_space<smem>>
    %c17 = arith.constant 17 : index
    %26 = memref.load %arg2[%c17] : memref<18xf32, #tpu.memory_space<smem>>
    %cst = arith.constant 0.000000e+00 : f32
    %27 = vector.broadcast %cst : f32 to vector<24x128xf32>
    %cst_9 = arith.constant 0.000000e+00 : f32
    %28 = vector.broadcast %cst_9 : f32 to vector<24x128xf32>
    %c0_10 = arith.constant 0 : index
    %c0_11 = arith.constant 0 : index
    %c0_12 = arith.constant 0 : index
    %c0_13 = arith.constant 0 : index
    %29 = vector.load %arg4[%c0_10, %c0_11, %c0_12, %c0_13] : memref<1x1x24x128xf32, #tpu.memory_space<vmem>>, vector<1x1x24x128xf32>
    %30 = vector.shape_cast %29 : vector<1x1x24x128xf32> to vector<24x128xf32>
    %cst_14 = arith.constant 0.000000e+00 : f32
    %31 = vector.broadcast %cst_14 : f32 to vector<24x128xf32>
    %32 = arith.select %8, %30, %31 : vector<24x128xi1>, vector<24x128xf32>
    %33 = vector.broadcast %9 : f32 to vector<24x128xf32>
    %34 = arith.mulf %32, %33 : vector<24x128xf32>
    %35 = arith.addf %27, %34 : vector<24x128xf32>
    %36 = vector.broadcast %18 : f32 to vector<24x128xf32>
    %37 = arith.mulf %32, %36 : vector<24x128xf32>
    %38 = arith.addf %28, %37 : vector<24x128xf32>
    %c1_i32 = arith.constant 1 : i32
    %39 = tpu.dynamic_rotate %32 by %c1_i32 dim 1 : vector<24x128xf32>, i32 -> vector<24x128xf32>
    %40 = vector.broadcast %10 : f32 to vector<24x128xf32>
    %41 = arith.mulf %39, %40 : vector<24x128xf32>
    %42 = arith.addf %35, %41 : vector<24x128xf32>
    %43 = vector.broadcast %19 : f32 to vector<24x128xf32>
    %44 = arith.mulf %39, %43 : vector<24x128xf32>
    %45 = arith.addf %38, %44 : vector<24x128xf32>
    %c2_i32 = arith.constant 2 : i32
    %46 = tpu.dynamic_rotate %32 by %c2_i32 dim 1 : vector<24x128xf32>, i32 -> vector<24x128xf32>
    %47 = vector.broadcast %11 : f32 to vector<24x128xf32>
    %48 = arith.mulf %46, %47 : vector<24x128xf32>
    %49 = arith.addf %42, %48 : vector<24x128xf32>
    %50 = vector.broadcast %20 : f32 to vector<24x128xf32>
    %51 = arith.mulf %46, %50 : vector<24x128xf32>
    %52 = arith.addf %45, %51 : vector<24x128xf32>
    %c1_i32_15 = arith.constant 1 : i32
    %53 = tpu.dynamic_rotate %32 by %c1_i32_15 dim 0 : vector<24x128xf32>, i32 -> vector<24x128xf32>
    %54 = vector.broadcast %12 : f32 to vector<24x128xf32>
    %55 = arith.mulf %53, %54 : vector<24x128xf32>
    %56 = arith.addf %49, %55 : vector<24x128xf32>
    %57 = vector.broadcast %21 : f32 to vector<24x128xf32>
    %58 = arith.mulf %53, %57 : vector<24x128xf32>
    %59 = arith.addf %52, %58 : vector<24x128xf32>
    %c1_i32_16 = arith.constant 1 : i32
    %60 = tpu.dynamic_rotate %53 by %c1_i32_16 dim 1 : vector<24x128xf32>, i32 -> vector<24x128xf32>
    %61 = vector.broadcast %13 : f32 to vector<24x128xf32>
    %62 = arith.mulf %60, %61 : vector<24x128xf32>
    %63 = arith.addf %56, %62 : vector<24x128xf32>
    %64 = vector.broadcast %22 : f32 to vector<24x128xf32>
    %65 = arith.mulf %60, %64 : vector<24x128xf32>
    %66 = arith.addf %59, %65 : vector<24x128xf32>
    %c2_i32_17 = arith.constant 2 : i32
    %67 = tpu.dynamic_rotate %53 by %c2_i32_17 dim 1 : vector<24x128xf32>, i32 -> vector<24x128xf32>
    %68 = vector.broadcast %14 : f32 to vector<24x128xf32>
    %69 = arith.mulf %67, %68 : vector<24x128xf32>
    %70 = arith.addf %63, %69 : vector<24x128xf32>
    %71 = vector.broadcast %23 : f32 to vector<24x128xf32>
    %72 = arith.mulf %67, %71 : vector<24x128xf32>
    %73 = arith.addf %66, %72 : vector<24x128xf32>
    %c2_i32_18 = arith.constant 2 : i32
    %74 = tpu.dynamic_rotate %32 by %c2_i32_18 dim 0 : vector<24x128xf32>, i32 -> vector<24x128xf32>
    %75 = vector.broadcast %15 : f32 to vector<24x128xf32>
    %76 = arith.mulf %74, %75 : vector<24x128xf32>
    %77 = arith.addf %70, %76 : vector<24x128xf32>
    %78 = vector.broadcast %24 : f32 to vector<24x128xf32>
    %79 = arith.mulf %74, %78 : vector<24x128xf32>
    %80 = arith.addf %73, %79 : vector<24x128xf32>
    %c1_i32_19 = arith.constant 1 : i32
    %81 = tpu.dynamic_rotate %74 by %c1_i32_19 dim 1 : vector<24x128xf32>, i32 -> vector<24x128xf32>
    %82 = vector.broadcast %16 : f32 to vector<24x128xf32>
    %83 = arith.mulf %81, %82 : vector<24x128xf32>
    %84 = arith.addf %77, %83 : vector<24x128xf32>
    %85 = vector.broadcast %25 : f32 to vector<24x128xf32>
    %86 = arith.mulf %81, %85 : vector<24x128xf32>
    %87 = arith.addf %80, %86 : vector<24x128xf32>
    %c2_i32_20 = arith.constant 2 : i32
    %88 = tpu.dynamic_rotate %74 by %c2_i32_20 dim 1 : vector<24x128xf32>, i32 -> vector<24x128xf32>
    %89 = vector.broadcast %17 : f32 to vector<24x128xf32>
    %90 = arith.mulf %88, %89 : vector<24x128xf32>
    %91 = arith.addf %84, %90 : vector<24x128xf32>
    %92 = vector.broadcast %26 : f32 to vector<24x128xf32>
    %93 = arith.mulf %88, %92 : vector<24x128xf32>
    %94 = arith.addf %87, %93 : vector<24x128xf32>
    %95 = tpu.concatenate %91, %94 in 0 : vector<24x128xf32>, vector<24x128xf32> -> vector<48x128xf32>
    %96 = arith.negf %95 : vector<48x128xf32>
    %97 = math.exp %96 : vector<48x128xf32>
    %cst_21 = arith.constant 1.000000e+00 : f32
    %98 = vector.broadcast %cst_21 : f32 to vector<48x128xf32>
    %99 = arith.addf %98, %97 : vector<48x128xf32>
    %100 = arith.divf %98, %99 : vector<48x128xf32>
    %c0_22 = arith.constant 0 : index
    %c0_23 = arith.constant 0 : index
    %c0_24 = arith.constant 0 : index
    %101 = vector.load %arg3[%c0_22, %c0_23, %c0_24] : memref<1x48x128xf32, #tpu.memory_space<vmem>>, vector<1x48x128xf32>
    %102 = vector.shape_cast %101 : vector<1x48x128xf32> to vector<48x128xf32>
    %103 = vector.shape_cast %100 : vector<48x128xf32> to vector<1x48x128xf32>
    tpu.vector_store %arg3[%c0_22, %c0_23, %c0_24], %103 {strides = array<i32>} : memref<1x48x128xf32, #tpu.memory_space<vmem>>, vector<1x48x128xf32>,
    return
  }
  func.func @transform_0(%arg0: i32) -> (i32, i32, i32, i32) {
    %c0_i32 = arith.constant 0 : i32
    %c0_i32_0 = arith.constant 0 : i32
    %c0_i32_1 = arith.constant 0 : i32
    %c0_i32_2 = arith.constant 0 : i32
    return %arg0, %c0_i32, %c0_i32_0, %c0_i32_1 : i32, i32, i32, i32
  }
  func.func @transform_1(%arg0: i32) -> i32 {
    %c0_i32 = arith.constant 0 : i32
    %c0_i32_0 = arith.constant 0 : i32
    return %c0_i32 : i32
  }
  func.func @transform_2(%arg0: i32) -> (i32, i32, i32) {
    %c0_i32 = arith.constant 0 : i32
    %c0_i32_0 = arith.constant 0 : i32
    %c0_i32_1 = arith.constant 0 : i32
    return %arg0, %c0_i32, %c0_i32_0 : i32, i32, i32
  }
}

</mosaic_0001>

<bundles_post_ra>
// kernel: conv_transpose2d_sigmoid.1
= control target key start
LH: loop header
LB: loop body
LE: loop exit
PB: predicated region body
PF: predicated region fallthrough
CT: control target
= control target key end

     0   :  { %7 = vsyncpa [#allocation4], 0  ;;  %s486_s0 = inlined_call_operand.vmem [shape: f32[1,1,16,16], index: 0, kind: input, shape index: {}]   ;;  %s487_s1 = inlined_call_operand.vmem [shape: f32[18], index: 1, kind: input, shape index: {}]   ;;  %s488_s2 = inlined_call_operand.vmem [shape: f32[1,48,128], index: 2, kind: output, shape index: {}]  }
   0x1   :  { %s16_s11 = sshll.u32 %s487_s1, 4  ;;  %s17_s11 = int_to_ptr.vmem [resolvable:$true] %s16_s11 }
   0x2   :  { %s340_s12 = scalar_lea.vmem %s17_s11, 16  ;;  %p345_p1 = scmp.lt.s32.totalorder %s17_s11, %s17_s11 }
   0x3   :  { %p341_p0 = scmp.ne.s32.totalorder %s17_s11, %s340_s12  ;;  %p346_p2 = scmp.lt.s32.totalorder %s340_s12, %s340_s12 }
   0x5   :  { %p347_p3 = por %p346_p2, %p345_p1 }
   0x7   :  { %p348_p4 = pnand %p347_p3, %p341_p0 }
   0x9   :  { %351 = shalt.err (!%p348_p4)
}
   0xa   :  { %s354_s13 = smov [#allocation3]  }
   0xb   :  { %19 = dma.vmem_to_smem %s17_s11, 16, %s354_s13, [#allocation4]  }
   0xc   :  { %352 = dma.done.wait [#allocation4], 16  }
   0xd   :  { %353 = vsyncadd [#allocation4], 4294967280 }
   0xe   :  { %23 = sfence }
   0xf   :  { %v24_v0 = vld [vmem:[%s486_s0] sm:$0xff]  ;;  %vm26_vm0 = vcmask 130048   ;;  %v29_v1 = vlaneseq  ;;  %v25_v2 = vld [vmem:[%s486_s0 + $0x8] sm:$0xff]  ;;  %v355_v3 = vmov 0.0   ;;  %s356_s17 = smov 1   ;;  %s357_s18 = smov 2  }
  0x10   :  { %84 = vrot.lane.b32.xlu1 %v355_v3, %s356_s17  ;;  %27 = vst.msk [vmem:[#allocation2] sm:$0xff] %vm26_vm0, %v24_v0  ;;  %28 = vst.msk [vmem:[#allocation2 + $0x8] sm:$0xff] %vm26_vm0, %v25_v2  ;;  %v122_v13 = vrot.slane %v355_v3, 7  ;;  %v183_v19 = vrot.slane %v355_v3, 6  ;;  %s42_s0 = sld [smem:[#allocation3]] }
  0x11   :  { %v34_v4 = vand.u32 127, %v29_v1  ;;  %v30_v5 = vshrl.u32 %v29_v1, 7  ;;  %s289_s19 = sld [smem:[#allocation3 + $0x1]] }
  0x12   :  { %s297_s20 = sld [smem:[#allocation3 + $0x9]] }
  0x13   :  { %vm38_vm1 = vcmp.lt.s32.totalorder %v34_v4, 16  ;;  %vm123_vm2 = vcmp.lt.s32.totalorder %v30_v5, 1  ;;  %vm184_vm3 = vcmp.lt.s32.totalorder %v30_v5, 2  ;;  %s298_s21 = sld [smem:[#allocation3 + $0xa]] }
  0x14   :  { %104 = vrot.lane.b32.xlu1 %v355_v3, %s357_s18  ;;  %s290_s22 = sld [smem:[#allocation3 + $0x2]] }
  0x15   :  { %s299_s23 = sld [smem:[#allocation3 + $0xb]] }
  0x16   :  { %s291_s24 = sld [smem:[#allocation3 + $0x3]]  ;;  %v66_v24 = vstv %s42_s0 }
  0x17   :  { %v60_v6 = vld [vmem:[#allocation2] sm:$0xff]  ;;  %v61_v7 = vld [vmem:[#allocation2 + $0x8] sm:$0xff]  ;;  %s300_s25 = sld [smem:[#allocation3 + $0xc]]  ;;  %v86_v26 = vstv %s289_s19  ;;  %v69_v40 = vmul.f32 0.0, %v66_v24 }
  0x18   :  { %v63_v8 = vsel %vm38_vm1, %v60_v6, 0.0  ;;  %v384_v9 = vsel %vm38_vm1, %v61_v7, 0.0  ;;  %v73_v25 = vstv %s297_s20  ;;  %s426_s26 = sld [smem:[#allocation3 + $0x6]] }
  0x19   :  { %80 = vrot.lane.b32.xlu0 %v63_v8, %s356_s17  ;;  %100 = vrot.lane.b32.xlu1 %v63_v8, %s357_s18  ;;  %v120_v10 = vrot.slane %v63_v8, 7  ;;  %v121_v11 = vrot.slane %v384_v9, 7  ;;  %v181_v15 = vrot.slane %v63_v8, 6  ;;  %v182_v16 = vrot.slane %v384_v9, 6  ;;  %s428_s27 = sld [smem:[#allocation3 + $0xf]] }
  0x1a   :  { %v93_v27 = vstv %s298_s21  ;;  %v106_v28 = vstv %s290_s22  ;;  %v67_v30 = vmul.f32 %v66_v24, %v63_v8  ;;  %v74_v31 = vmul.f32 %v73_v25, %v63_v8  ;;  %s430_s28 = sld [smem:[#allocation3 + $0x5]] }
  0x1b   :  { %v389_v12 = vsel %vm123_vm2, %v120_v10, %v121_v11  ;;  %v126_v14 = vsel %vm123_vm2, %v122_v13, %v120_v10  ;;  %v399_v17 = vsel %vm123_vm2, %v121_v11, %v122_v13  ;;  %v404_v18 = vsel %vm184_vm3, %v181_v15, %v182_v16  ;;  %s432_s29 = sld [smem:[#allocation3 + $0xe]] }
  0x1c   :  { %v410_v20 = vsel %vm184_vm3, %v183_v19, %v181_v15  ;;  %v416_v21 = vsel %vm184_vm3, %v182_v16, %v183_v19  ;;  %v113_v29 = vstv %s299_s23  ;;  %v127_v32 = vstv %s291_s24  ;;  %s434_s30 = sld [smem:[#allocation3 + $0x4]] }
  0x1d   :  { %82 = vrot.lane.b32.xlu0 %v384_v9, %s356_s17  ;;  %143 = vrot.lane.b32.xlu1 %v389_v12, %s356_s17  ;;  %v134_v33 = vstv %s300_s25  ;;  %v76_v41 = vmul.f32 0.0, %v73_v25  ;;  %s436_s3 = sld [smem:[#allocation3 + $0xd]]  ;;  %v128_v44 = vmul.f32 %v127_v32, %v126_v14  ;;  %v68_v48 = vmul.f32 %v66_v24, %v384_v9 }
  0x1e   :  { %v135_v45 = vmul.f32 %v134_v33, %v126_v14  ;;  %v75_v49 = vmul.f32 %v73_v25, %v384_v9  ;;  %v188_v56 = vstv %s426_s26  ;;  %v129_v0 = vmul.f32 %v127_v32, %v389_v12  ;;  %s450_s4 = sld [smem:[#allocation3 + $0x8]] }
  0x1f   :  { %v195_v57 = vstv %s428_s27  ;;  %v136_v1 = vmul.f32 %v134_v33, %v389_v12  ;;  %v130_v10 = vmul.f32 %v127_v32, %v399_v17  ;;  %v137_v11 = vmul.f32 %v134_v33, %v399_v17  ;;  %s452_s5 = sld [smem:[#allocation3 + $0x11]] }
  0x20   :  { %v167_v3 = vstv %s430_s28  ;;  %s454_s6 = sld [smem:[#allocation3 + $0x7]] }
  0x21   :  { %102 = vrot.lane.b32.xlu0 %v384_v9, %s357_s18  ;;  %161 = vrot.lane.b32.xlu1 %v126_v14, %s357_s18  ;;  %v174_v4 = vstv %s432_s29  ;;  %s458_s7 = sld [smem:[#allocation3 + $0x10]] }
  0x22   :  { %v147_v13 = vstv %s434_s30 }
  0x25   :  { %141 = vrot.lane.b32.xlu0 %v126_v14, %s356_s17  ;;  %165 = vrot.lane.b32.xlu1 %v399_v17, %s357_s18  ;;  %v154_v14 = vstv %s436_s3 }
  0x29   :  { %145 = vrot.lane.b32.xlu0 %v399_v17, %s356_s17  ;;  %204 = vrot.lane.b32.xlu1 %v404_v18, %s356_s17  ;;  %v189_v17 = vmul.f32 %v188_v56, %v410_v20 }
  0x2d   :  { %163 = vrot.lane.b32.xlu0 %v389_v12, %s357_s18  ;;  %222 = vrot.lane.b32.xlu1 %v410_v20, %s357_s18 }
  0x31   :  { %202 = vrot.lane.b32.xlu0 %v410_v20, %s356_s17  ;;  %226 = vrot.lane.b32.xlu1 %v416_v21, %s357_s18 }
  0x35   :  { %206 = vrot.lane.b32.xlu0 %v416_v21, %s356_s17 }
  0x39   :  { %224 = vrot.lane.b32.xlu0 %v404_v18, %s357_s18 }
  0x82   :  { %v85_v22 = vpop.permute.xlu1 %84 }
  0x83   :  { %v89_v42 = vmul.f32 %v86_v26, %v85_v22  ;;  %v96_v43 = vmul.f32 %v93_v27, %v85_v22 }
  0x85   :  { %v92_v58 = vadd.f32 %v89_v42, %v69_v40  ;;  %v99_v59 = vadd.f32 %v96_v43, %v76_v41 }
  0x86   :  { %v105_v23 = vpop.permute.xlu1 %104 }
  0x87   :  { %v109_v60 = vmul.f32 %v106_v28, %v105_v23  ;;  %v116_v61 = vmul.f32 %v113_v29, %v105_v23 }
  0x89   :  { %v112_v15 = vadd.f32 %v109_v60, %v92_v58  ;;  %v119_v16 = vadd.f32 %v116_v61, %v99_v59  ;;  %v235_v58 = vstv %s452_s5 }
  0x8b   :  { %v81_v34 = vpop.permute.xlu0 %80  ;;  %v101_v35 = vpop.permute.xlu1 %100  ;;  %v133_v33 = vadd.f32 %v130_v10, %v112_v15 }
  0x8c   :  { %v87_v36 = vmul.f32 %v86_v26, %v81_v34  ;;  %v94_v37 = vmul.f32 %v93_v27, %v81_v34  ;;  %v107_v38 = vmul.f32 %v106_v28, %v101_v35  ;;  %v114_v39 = vmul.f32 %v113_v29, %v101_v35 }
  0x8d   :  { %v140_v34 = vadd.f32 %v137_v11, %v119_v16 }
  0x8e   :  { %v90_v46 = vadd.f32 %v87_v36, %v67_v30  ;;  %v97_v47 = vadd.f32 %v94_v37, %v74_v31  ;;  %v196_v30 = vmul.f32 %v195_v57, %v410_v20  ;;  %v190_v20 = vmul.f32 %v188_v56, %v404_v18 }
  0x8f   :  { %v83_v50 = vpop.permute.xlu0 %82  ;;  %v144_v51 = vpop.permute.xlu1 %143 }
  0x90   :  { %v110_v52 = vadd.f32 %v107_v38, %v90_v46  ;;  %v117_v53 = vadd.f32 %v114_v39, %v97_v47  ;;  %v88_v54 = vmul.f32 %v86_v26, %v83_v50  ;;  %v95_v55 = vmul.f32 %v93_v27, %v83_v50 }
  0x91   :  { %v149_v35 = vmul.f32 %v147_v13, %v144_v51  ;;  %v156_v36 = vmul.f32 %v154_v14, %v144_v51  ;;  %v191_v46 = vmul.f32 %v188_v56, %v416_v21  ;;  %v198_v47 = vmul.f32 %v195_v57, %v416_v21 }
  0x92   :  { %v131_v62 = vadd.f32 %v128_v44, %v110_v52  ;;  %v138_v63 = vadd.f32 %v135_v45, %v117_v53  ;;  %v91_v6 = vadd.f32 %v88_v54, %v68_v48  ;;  %v98_v7 = vadd.f32 %v95_v55, %v75_v49 }
  0x93   :  { %v103_v2 = vpop.permute.xlu0 %102  ;;  %v162_v5 = vpop.permute.xlu1 %161  ;;  %v197_v45 = vmul.f32 %v195_v57, %v404_v18  ;;  %v228_v55 = vstv %s450_s4  ;;  %v215_v56 = vstv %s458_s7 }
  0x94   :  { %v108_v8 = vmul.f32 %v106_v28, %v103_v2  ;;  %v115_v9 = vmul.f32 %v113_v29, %v103_v2  ;;  %v168_v23 = vmul.f32 %v167_v3, %v162_v5  ;;  %v175_v24 = vmul.f32 %v174_v4, %v162_v5 }
  0x96   :  { %v111_v19 = vadd.f32 %v108_v8, %v91_v6  ;;  %v118_v22 = vadd.f32 %v115_v9, %v98_v7 }
  0x97   :  { %v142_v12 = vpop.permute.xlu0 %141  ;;  %v166_v25 = vpop.permute.xlu1 %165 }
  0x98   :  { %v132_v26 = vadd.f32 %v129_v0, %v111_v19  ;;  %v139_v27 = vadd.f32 %v136_v1, %v118_v22  ;;  %v148_v28 = vmul.f32 %v147_v13, %v142_v12  ;;  %v155_v29 = vmul.f32 %v154_v14, %v142_v12 }
  0x99   :  { %v170_v38 = vmul.f32 %v167_v3, %v166_v25  ;;  %v177_v39 = vmul.f32 %v174_v4, %v166_v25 }
  0x9a   :  { %v151_v31 = vadd.f32 %v148_v28, %v131_v62  ;;  %v158_v32 = vadd.f32 %v155_v29, %v138_v63  ;;  %v152_v52 = vadd.f32 %v149_v35, %v132_v26  ;;  %v159_v53 = vadd.f32 %v156_v36, %v139_v27 }
  0x9b   :  { %v146_v37 = vpop.permute.xlu0 %145  ;;  %v205_v40 = vpop.permute.xlu1 %204  ;;  %v208_v63 = vstv %s454_s6 }
  0x9c   :  { %v171_v41 = vadd.f32 %v168_v23, %v151_v31  ;;  %v178_v42 = vadd.f32 %v175_v24, %v158_v32  ;;  %v150_v43 = vmul.f32 %v147_v13, %v146_v37  ;;  %v157_v44 = vmul.f32 %v154_v14, %v146_v37 }
  0x9d   :  { %v210_v15 = vmul.f32 %v208_v63, %v205_v40  ;;  %v217_v24 = vmul.f32 %v215_v56, %v205_v40 }
  0x9e   :  { %v153_v48 = vadd.f32 %v150_v43, %v133_v33  ;;  %v160_v49 = vadd.f32 %v157_v44, %v140_v34  ;;  %v192_v50 = vadd.f32 %v189_v17, %v171_v41  ;;  %v199_v51 = vadd.f32 %v196_v30, %v178_v42 }
  0x9f   :  { %v164_v54 = vpop.permute.xlu0 %163  ;;  %v223_v59 = vpop.permute.xlu1 %222 }
  0xa0   :  { %v173_v60 = vadd.f32 %v170_v38, %v153_v48  ;;  %v180_v61 = vadd.f32 %v177_v39, %v160_v49  ;;  %v169_v62 = vmul.f32 %v167_v3, %v164_v54  ;;  %v176_v18 = vmul.f32 %v174_v4, %v164_v54 }
  0xa1   :  { %v229_v5 = vmul.f32 %v228_v55, %v223_v59  ;;  %v236_v6 = vmul.f32 %v235_v58, %v223_v59 }
  0xa2   :  { %v172_v0 = vadd.f32 %v169_v62, %v152_v52  ;;  %v179_v1 = vadd.f32 %v176_v18, %v159_v53  ;;  %v194_v21 = vadd.f32 %v191_v46, %v173_v60  ;;  %v201_v57 = vadd.f32 %v198_v47, %v180_v61 }
  0xa3   :  { %v203_v2 = vpop.permute.xlu0 %202  ;;  %v227_v11 = vpop.permute.xlu1 %226 }
  0xa4   :  { %v193_v7 = vadd.f32 %v190_v20, %v172_v0  ;;  %v200_v8 = vadd.f32 %v197_v45, %v179_v1  ;;  %v209_v9 = vmul.f32 %v208_v63, %v203_v2  ;;  %v216_v10 = vmul.f32 %v215_v56, %v203_v2 }
  0xa5   :  { %v231_v3 = vmul.f32 %v228_v55, %v227_v11  ;;  %v238_v4 = vmul.f32 %v235_v58, %v227_v11 }
  0xa6   :  { %v212_v13 = vadd.f32 %v209_v9, %v192_v50  ;;  %v219_v14 = vadd.f32 %v216_v10, %v199_v51  ;;  %v213_v29 = vadd.f32 %v210_v15, %v193_v7  ;;  %v220_v33 = vadd.f32 %v217_v24, %v200_v8 }
  0xa7   :  { %v207_v16 = vpop.permute.xlu0 %206 }
  0xa8   :  { %v232_v19 = vadd.f32 %v229_v5, %v212_v13  ;;  %v239_v22 = vadd.f32 %v236_v6, %v219_v14  ;;  %v211_v12 = vmul.f32 %v208_v63, %v207_v16  ;;  %v218_v23 = vmul.f32 %v215_v56, %v207_v16 }
  0xaa   :  { %v306_v25 = vmul.f32 -1.442695, %v232_v19  ;;  %v309_v26 = vmul.f32 -1.442695, %v239_v22  ;;  %v214_v27 = vadd.f32 %v211_v12, %v194_v21  ;;  %v221_v28 = vadd.f32 %v218_v23, %v201_v57 }
  0xab   :  { %v225_v17 = vpop.permute.xlu0 %224 }
  0xac   :  { %316 = vpow2.f32 %v306_v25  ;;  %v234_v30 = vadd.f32 %v231_v3, %v214_v27  ;;  %v241_v31 = vadd.f32 %v238_v4, %v221_v28  ;;  %v230_v32 = vmul.f32 %v228_v55, %v225_v17 }
  0xad   :  { %318 = vpow2.f32 %v309_v26  ;;  %v237_v34 = vmul.f32 %v235_v58, %v225_v17 }
  0xae   :  { %v308_v35 = vmul.f32 -1.442695, %v234_v30  ;;  %v311_v36 = vmul.f32 -1.442695, %v241_v31  ;;  %v233_v37 = vadd.f32 %v230_v32, %v213_v29 }
  0xaf   :  { %v240_v38 = vadd.f32 %v237_v34, %v220_v33 }
  0xb0   :  { %320 = vpow2.f32 %v308_v35  ;;  %v307_v39 = vmul.f32 -1.442695, %v233_v37 }
  0xb1   :  { %322 = vpow2.f32 %v311_v36  ;;  %v310_v40 = vmul.f32 -1.442695, %v240_v38 }
  0xb2   :  { %324 = vpow2.f32 %v307_v39 }
  0xb3   :  { %326 = vpow2.f32 %v310_v40 }
  0xb9   :  { %v317_v41 = vpop.eup %316 }
  0xba   :  { %v319_v42 = vpop.eup %318  ;;  %v260_v43 = vadd.f32 1.0, %v317_v41 }
  0xbb   :  { %v263_v44 = vadd.f32 1.0, %v319_v42 }
  0xbc   :  { %328 = vrcp.f32 %v260_v43 }
  0xbd   :  { %v321_v20 = vpop.eup %320  ;;  %330 = vrcp.f32 %v263_v44 }
  0xbe   :  { %v323_v45 = vpop.eup %322  ;;  %v262_v46 = vadd.f32 1.0, %v321_v20 }
  0xbf   :  { %v325_v47 = vpop.eup %324  ;;  %v265_v48 = vadd.f32 1.0, %v323_v45 }
  0xc0   :  { %v327_v49 = vpop.eup %326  ;;  %332 = vrcp.f32 %v262_v46  ;;  %v261_v50 = vadd.f32 1.0, %v325_v47 }
  0xc1   :  { %334 = vrcp.f32 %v265_v48  ;;  %v264_v51 = vadd.f32 1.0, %v327_v49 }
  0xc2   :  { %336 = vrcp.f32 %v261_v50 }
  0xc3   :  { %338 = vrcp.f32 %v264_v51 }
  0xc9   :  { %v329_v52 = vpop.eup %328 }
  0xca   :  { %v331_v53 = vpop.eup %330  ;;  %278 = vst [vmem:[%s488_s2] sm:$0xff] %v329_v52 }
  0xcb   :  { %281 = vst [vmem:[%s488_s2 + $0x18] sm:$0xff] %v331_v53 }
  0xcd   :  { %v333_v54 = vpop.eup %332 }
  0xce   :  { %v335_v55 = vpop.eup %334  ;;  %280 = vst [vmem:[%s488_s2 + $0x10] sm:$0xff] %v333_v54 }
  0xcf   :  { %v337_v58 = vpop.eup %336  ;;  %283 = vst [vmem:[%s488_s2 + $0x28] sm:$0xff] %v335_v55 }
  0xd0   :  { %v339_v59 = vpop.eup %338  ;;  %279 = vst [vmem:[%s488_s2 + $0x8] sm:$0xff] %v337_v58 }
  0xd1   :  { %282 = vst [vmem:[%s488_s2 + $0x20] sm:$0xff] %v339_v59 }
  0xd2   :  { %288 = vsyncpa [#allocation4], 1 }

</bundles_post_ra>
